<compile_context>
chip_gen: v7x
topology: tpu7x:2x2x1
jax: 0.10.0
libtpu: 0.0.40
codegen_flags: <defaults>
</compile_context>

<pallas_src>
import functools

import numpy as np
import jax
import jax.numpy as jnp
from jax import lax
from jax.experimental import pallas as pl
from jax.experimental.pallas import tpu as pltpu


_INV_SQRT2 = float(1.0 / np.sqrt(2.0))
_LANES = 128
_SUBLANES = 8


def _round_up(x, m):
    return ((x + m - 1) // m) * m


def _gauss_cdf_kernel(ws_ref, wss_ref, pt_ref, cdf_ref, *, inv_w, inv_wm1):
    # ws_ref : (TR, 128) windowed sum of centered X
    # wss_ref: (TR, 128) windowed sum of centered X^2
    # pt_ref : (TR, 128) centered "next point" of each window
    ws = ws_ref[...]
    wss = wss_ref[...]
    pt = pt_ref[...]

    mean = ws * jnp.float32(inv_w)
    # unbiased variance (ddof=1), guarded against tiny negative from rounding
    var = (wss - ws * mean) * jnp.float32(inv_wm1)
    var = jnp.maximum(var, jnp.float32(0.0))
    std = jnp.sqrt(var) + jnp.float32(1e-6)

    # EUP-side approximate reciprocal: std has a 1e-6 floor and the result only
    # feeds a <= threshold comparison, so the precision loss is harmless.
    z = (pt - mean) * pl.reciprocal(std, approx=True) * jnp.float32(_INV_SQRT2)
    cdf_ref[...] = jnp.float32(0.5) * (jnp.float32(1.0) + lax.erf(z))


def _p_scorer_pallas(ws, wss, ptc, window_length, tile_rows=512):
    """ws/wss/ptc: (M,) f32 windowed sums / sumsq / centered points -> cdf (M,) f32."""
    M = ws.shape[0]

    # Lane-dense layout: flatten M onto (rows, 128); tile rows in multiples of 8.
    rows = _round_up(-(-M // _LANES), _SUBLANES)
    tr = min(_round_up(tile_rows, _SUBLANES), rows)
    rows_pad = _round_up(rows, tr)
    m_pad = rows_pad * _LANES

    def as_slab(v):
        return jnp.pad(v, (0, m_pad - M)).reshape(rows_pad, _LANES)

    ws2, wss2, pt2 = as_slab(ws), as_slab(wss), as_slab(ptc)

    kernel = functools.partial(
        _gauss_cdf_kernel,
        inv_w=1.0 / float(window_length),
        inv_wm1=1.0 / float(window_length - 1),
    )

    grid = (rows_pad // tr,)
    cdf2 = pl.pallas_call(
        kernel,
        out_shape=jax.ShapeDtypeStruct((rows_pad, _LANES), jnp.float32),
        grid_spec=pltpu.PrefetchScalarGridSpec(
            num_scalar_prefetch=0,
            grid=grid,
            in_specs=[
                pl.BlockSpec((tr, _LANES), lambda i: (i, 0)),
                pl.BlockSpec((tr, _LANES), lambda i: (i, 0)),
                pl.BlockSpec((tr, _LANES), lambda i: (i, 0)),
            ],
            out_specs=pl.BlockSpec((tr, _LANES), lambda i: (i, 0)),
        ),
        compiler_params=pltpu.CompilerParams(
            dimension_semantics=("parallel",),
            vmem_limit_bytes=32 * 1024 * 1024,
        ),
    )(ws2, wss2, pt2)

    # Keep the [:M] slice adjacent to the pallas_call: padded lanes score 0.5.
    return cdf2.reshape(-1)[:M]


def auto_gaussian_slider(X, tts, slider_perc=0.05, threshold=0.01):
    """JAX/Pallas equivalent of AutoGaussianSlider.forward.

    Args:
      X:   (N,) float32 preprocessed differences.
      tts: (N,) float32 time-to-time differences.
    Returns:
      (t_points[mask], points[mask]) — same semantics as the torch module.
    """
    X = jnp.asarray(X, jnp.float32)
    tts = jnp.asarray(tts, jnp.float32)
    N = X.shape[0]
    W = int(N * slider_perc)
    if W < 2:
        raise ValueError("window_length = int(N * slider_perc) must be >= 2")
    P = N - W + 1          # number of unfold patches
    M = P - 1              # rows after [:-1] / [1:]

    # Prefix-sum formulation on centered data (z-score is shift invariant).
    Xc = X - jnp.mean(X)
    zero = jnp.zeros((1,), jnp.float32)
    S1 = jnp.concatenate([zero, jnp.cumsum(Xc)])
    S2 = jnp.concatenate([zero, jnp.cumsum(Xc * Xc)])

    ws = S1[W:W + M] - S1[:M]        # sum of window i = X[i : i+W]   (centered)
    wss = S2[W:W + M] - S2[:M]       # sum of squares of window i     (centered)
    ptc = Xc[1:1 + M]                # patches[1:, 0], centered

    cdf = _p_scorer_pallas(ws, wss, ptc, W)       # hot path on TPU
    mask = cdf <= jnp.float32(threshold)

    points = X[1:P]                  # patches[1:, 0]
    t_points = tts[1:P]              # t_patches[1:, 0]

    # TODO(synk): dynamic-shape boolean selection has no static-shape Pallas
    # equivalent; done on host numpy, matching results_.le(threshold) indexing.
    mask_np = np.asarray(mask)
    return (jnp.asarray(np.asarray(t_points)[mask_np]),
            jnp.asarray(np.asarray(points)[mask_np]))


def _reference_cdf(X, slider_perc):
    """Direct (torch-style) per-window mean/std reference, for validation."""
    X = jnp.asarray(X, jnp.float32)
    N = X.shape[0]
    W = int(N * slider_perc)
    P = N - W + 1
    M = P - 1
    idx = jnp.arange(M)[:, None] + jnp.arange(W)[None, :]
    win = X[idx]
    mean = jnp.mean(win, axis=1)
    var = jnp.sum((win - mean[:, None]) ** 2, axis=1) / jnp.float32(W - 1)
    std = jnp.sqrt(var) + jnp.float32(1e-6)
    z = (X[1:P] - mean) / std * jnp.float32(_INV_SQRT2)
    return 0.5 * (1.0 + lax.erf(z))


if __name__ == "__main__":
    key = jax.random.PRNGKey(0)
    k1, k2 = jax.random.split(key)
    N = 256                                             # -> window_length = 12
    X = jax.random.normal(k1, (N,), dtype=jnp.float32)
    tts = jnp.cumsum(jnp.abs(jax.random.normal(k2, (N,), dtype=jnp.float32)))

    # Run the Pallas hot path once and sanity-check vs the direct formulation.
    W = int(N * 0.05)
    P = N - W + 1
    M = P - 1
    Xc = X - jnp.mean(X)
    zero = jnp.zeros((1,), jnp.float32)
    S1 = jnp.concatenate([zero, jnp.cumsum(Xc)])
    S2 = jnp.concatenate([zero, jnp.cumsum(Xc * Xc)])
    cdf_pallas = _p_scorer_pallas(S1[W:W + M] - S1[:M],
                                  S2[W:W + M] - S2[:M],
                                  Xc[1:1 + M], W)
    cdf_ref = _reference_cdf(X, 0.05)
    np.testing.assert_allclose(np.asarray(cdf_pallas), np.asarray(cdf_ref),
                               atol=2e-3, rtol=1e-2)

    t_sel, p_sel = auto_gaussian_slider(X, tts, slider_perc=0.05, threshold=0.01)
    jax.block_until_ready((t_sel, p_sel, cdf_pallas))
    print("KERNEL_OK")
</pallas_src>

<mosaic_0001>
module attributes {stable_mosaic.version = 11 : i64} {
  func.func @_gauss_cdf_kernel(%arg0: i32, %arg1: memref<8x128xf32, #tpu.memory_space<vmem>>, %arg2: memref<8x128xf32, #tpu.memory_space<vmem>>, %arg3: memref<8x128xf32, #tpu.memory_space<vmem>>, %arg4: memref<8x128xf32, #tpu.memory_space<vmem>>) attributes {dimension_semantics = [#tpu.dimension_semantics<parallel>], iteration_bounds = array<i64: 1>, scalar_prefetch = 0 : i64, scratch_operands = 0 : i64, tpu.core_type = #tpu.core_type<tc>, window_params = [{transform_indices = @transform_0, window_bounds = array<i64: 8, 128>}, {transform_indices = @transform_1, window_bounds = array<i64: 8, 128>}, {transform_indices = @transform_2, window_bounds = array<i64: 8, 128>}, {transform_indices = @transform_3, window_bounds = array<i64: 8, 128>}]} {
    %c0 = arith.constant 0 : index
    %c0_0 = arith.constant 0 : index
    %0 = vector.load %arg1[%c0, %c0_0] : memref<8x128xf32, #tpu.memory_space<vmem>>, vector<8x128xf32>
    %c0_1 = arith.constant 0 : index
    %c0_2 = arith.constant 0 : index
    %1 = vector.load %arg2[%c0_1, %c0_2] : memref<8x128xf32, #tpu.memory_space<vmem>>, vector<8x128xf32>
    %c0_3 = arith.constant 0 : index
    %c0_4 = arith.constant 0 : index
    %2 = vector.load %arg3[%c0_3, %c0_4] : memref<8x128xf32, #tpu.memory_space<vmem>>, vector<8x128xf32>
    %cst = arith.constant 0.0833333358 : f32
    %3 = vector.broadcast %cst : f32 to vector<8x128xf32>
    %4 = arith.mulf %0, %3 : vector<8x128xf32>
    %5 = arith.mulf %0, %4 : vector<8x128xf32>
    %6 = arith.subf %1, %5 : vector<8x128xf32>
    %cst_5 = arith.constant 0.0909090936 : f32
    %7 = vector.broadcast %cst_5 : f32 to vector<8x128xf32>
    %8 = arith.mulf %6, %7 : vector<8x128xf32>
    %cst_6 = arith.constant 0.000000e+00 : f32
    %9 = vector.broadcast %cst_6 : f32 to vector<8x128xf32>
    %10 = arith.maximumf %8, %9 : vector<8x128xf32>
    %11 = math.sqrt %10 : vector<8x128xf32>
    %cst_7 = arith.constant 9.99999997E-7 : f32
    %12 = vector.broadcast %cst_7 : f32 to vector<8x128xf32>
    %13 = arith.addf %11, %12 : vector<8x128xf32>
    %14 = arith.subf %2, %4 : vector<8x128xf32>
    %15 = tpu.reciprocal %13 {approx = true} : vector<8x128xf32> -> vector<8x128xf32>
    %16 = arith.mulf %14, %15 : vector<8x128xf32>
    %cst_8 = arith.constant 0.707106769 : f32
    %17 = vector.broadcast %cst_8 : f32 to vector<8x128xf32>
    %18 = arith.mulf %16, %17 : vector<8x128xf32>
    %19 = math.erf %18 : vector<8x128xf32>
    %cst_9 = arith.constant 1.000000e+00 : f32
    %20 = vector.broadcast %cst_9 : f32 to vector<8x128xf32>
    %21 = arith.addf %20, %19 : vector<8x128xf32>
    %cst_10 = arith.constant 5.000000e-01 : f32
    %22 = vector.broadcast %cst_10 : f32 to vector<8x128xf32>
    %23 = arith.mulf %22, %21 : vector<8x128xf32>
    %c0_11 = arith.constant 0 : index
    %c0_12 = arith.constant 0 : index
    %24 = vector.load %arg4[%c0_11, %c0_12] : memref<8x128xf32, #tpu.memory_space<vmem>>, vector<8x128xf32>
    tpu.vector_store %arg4[%c0_11, %c0_12], %23 {strides = array<i32>} : memref<8x128xf32, #tpu.memory_space<vmem>>, vector<8x128xf32>,
    return
  }
  func.func @transform_0(%arg0: i32) -> (i32, i32) {
    %c0_i32 = arith.constant 0 : i32
    %c0_i32_0 = arith.constant 0 : i32
    return %arg0, %c0_i32 : i32, i32
  }
  func.func @transform_1(%arg0: i32) -> (i32, i32) {
    %c0_i32 = arith.constant 0 : i32
    %c0_i32_0 = arith.constant 0 : i32
    return %arg0, %c0_i32 : i32, i32
  }
  func.func @transform_2(%arg0: i32) -> (i32, i32) {
    %c0_i32 = arith.constant 0 : i32
    %c0_i32_0 = arith.constant 0 : i32
    return %arg0, %c0_i32 : i32, i32
  }
  func.func @transform_3(%arg0: i32) -> (i32, i32) {
    %c0_i32 = arith.constant 0 : i32
    %c0_i32_0 = arith.constant 0 : i32
    return %arg0, %c0_i32 : i32, i32
  }
}

</mosaic_0001>

<bundles_post_ra>
// kernel: tpu_custom_call.1
= control target key start
LH: loop header
LB: loop body
LE: loop exit
PB: predicated region body
PF: predicated region fallthrough
CT: control target
= control target key end

     0   :  { %8 = vsyncpa [#allocation3], 0  ;;  %s266_s0 = inlined_call_operand.hbm [shape: f32[8,128], index: 0, kind: input, shape index: {}]   ;;  %s267_s1 = inlined_call_operand.hbm [shape: f32[8,128], index: 1, kind: input, shape index: {}]   ;;  %s268_s2 = inlined_call_operand.hbm [shape: f32[8,128], index: 2, kind: input, shape index: {}]   ;;  %s269_s3 = inlined_call_operand.hbm [shape: f32[8,128], index: 3, kind: output, shape index: {}]  }
   0x1   :  { %9 = vsyncpa [#allocation6], 0 }
   0x2   :  { %10 = vsyncpa [#allocation4], 0  ;;  %s194_s12 = smov [#allocation5]   ;;  %s195_s14 = smov [#allocation2]  }
   0x3   :  { %s27_s13 = sshll.u32 %s194_s12, 4  ;;  %s17_s15 = sshll.u32 %s195_s14, 4  ;;  %s28_s13 = int_to_ptr.vmem [resolvable:$true] %s27_s13  ;;  %s18_s15 = int_to_ptr.vmem [resolvable:$true] %s17_s15 }
   0x4   :  { %s100_s18 = scalar_lea.hbm %s267_s1, 128 }
   0x5   :  { %p101_p0 = scmp.ne.s32.totalorder %s267_s1, %s100_s18  ;;  %p104_p1 = scmp.lt.u32.totalorder %s100_s18, %s267_s1 }
   0x7   :  { %p106_p2 = pnand %p104_p1, %p101_p0 }
   0x9   :  { %109 = shalt.err (!%p106_p2)
}
   0xa   :  { %s110_s23 = scalar_lea.vmem %s28_s13, 128  ;;  %p115_p4 = scmp.lt.s32.totalorder %s28_s13, %s28_s13 }
   0xb   :  { %p111_p3 = scmp.ne.s32.totalorder %s28_s13, %s110_s23  ;;  %p116_p5 = scmp.lt.s32.totalorder %s110_s23, %s110_s23 }
   0xd   :  { %p117_p6 = por %p116_p5, %p115_p4 }
   0xf   :  { %p118_p7 = pnand %p117_p6, %p111_p3 }
  0x11   :  { %121 = shalt.err (!%p118_p7)
}
  0x12   :  { %30 = dma.hbm_to_vmem [thread:$0]  %s267_s1, 128, %s28_s13, [#allocation6]  }
  0x13   :  { %s122_s28 = scalar_lea.hbm %s266_s0, 128 }
  0x14   :  { %p123_p8 = scmp.ne.s32.totalorder %s266_s0, %s122_s28  ;;  %p126_p9 = scmp.lt.u32.totalorder %s122_s28, %s266_s0 }
  0x16   :  { %p128_p10 = pnand %p126_p9, %p123_p8 }
  0x18   :  { %131 = shalt.err (!%p128_p10)
}
  0x19   :  { %s132_s6 = scalar_lea.vmem %s18_s15, 128  ;;  %p137_p12 = scmp.lt.s32.totalorder %s18_s15, %s18_s15 }
  0x1a   :  { %p133_p11 = scmp.ne.s32.totalorder %s18_s15, %s132_s6  ;;  %p138_p13 = scmp.lt.s32.totalorder %s132_s6, %s132_s6 }
  0x1c   :  { %p139_p0 = por %p138_p13, %p137_p12 }
  0x1e   :  { %p140_p1 = pnand %p139_p0, %p133_p11 }
  0x20   :  { %143 = shalt.err (!%p140_p1)
}
  0x21   :  { %20 = dma.hbm_to_vmem [thread:$0]  %s266_s0, 128, %s18_s15, [#allocation3]  }
  0x22   :  { %s196_s8 = smov [#allocation7]   ;;  %s144_s12 = scalar_lea.hbm %s268_s2, 128 }
  0x23   :  { %s37_s9 = sshll.u32 %s196_s8, 4  ;;  %p145_p2 = scmp.ne.s32.totalorder %s268_s2, %s144_s12  ;;  %s38_s9 = int_to_ptr.vmem [resolvable:$true] %s37_s9 }
  0x24   :  { %p148_p3 = scmp.lt.u32.totalorder %s144_s12, %s268_s2 }
  0x26   :  { %p150_p4 = pnand %p148_p3, %p145_p2 }
  0x28   :  { %153 = shalt.err (!%p150_p4)
}
  0x29   :  { %s154_s18 = scalar_lea.vmem %s38_s9, 128  ;;  %p159_p6 = scmp.lt.s32.totalorder %s38_s9, %s38_s9 }
  0x2a   :  { %p155_p5 = scmp.ne.s32.totalorder %s38_s9, %s154_s18  ;;  %p160_p7 = scmp.lt.s32.totalorder %s154_s18, %s154_s18 }
  0x2c   :  { %p161_p8 = por %p160_p7, %p159_p6 }
  0x2e   :  { %p162_p9 = pnand %p161_p8, %p155_p5 }
  0x30   :  { %165 = shalt.err (!%p162_p9)
}
  0x31   :  { %40 = dma.hbm_to_vmem [thread:$0]  %s268_s2, 128, %s38_s9, [#allocation6]  }
  0x32   :  { %188 = dma.done.wait [#allocation3], 128  }
  0x33   :  { %189 = vsyncadd [#allocation3], 4294967168 }
  0x34   :  { %190 = dma.done.wait [#allocation6], 256  }
  0x35   :  { %191 = vsyncadd [#allocation6], 4294967040  ;;  %v50_v0 = vld [vmem:[#allocation2] sm:$0xff]  ;;  %v51_v2 = vld [vmem:[#allocation5] sm:$0xff]  ;;  %s197_s2 = smov [#allocation8]  }
  0x36   :  { %v53_v1 = vmul.f32 0.083333336, %v50_v0  ;;  %v52_v13 = vld [vmem:[#allocation7] sm:$0xff]  ;;  %s80_s19 = sshll.u32 %s197_s2, 4  ;;  %s81_s19 = int_to_ptr.vmem [resolvable:$true] %s80_s19 }
  0x37   :  { %s166_s20 = scalar_lea.vmem %s81_s19, 128  ;;  %p171_p11 = scmp.lt.s32.totalorder %s81_s19, %s81_s19 }
  0x38   :  { %v54_v3 = vmul.f32 %v53_v1, %v50_v0  ;;  %v66_v14 = vsub.f32 %v52_v13, %v53_v1  ;;  %p167_p10 = scmp.ne.s32.totalorder %s81_s19, %s166_s20  ;;  %p172_p12 = scmp.lt.s32.totalorder %s166_s20, %s166_s20 }
  0x3a   :  { %v55_v4 = vsub.f32 %v51_v2, %v54_v3  ;;  %p173_p13 = por %p172_p12, %p171_p11 }
  0x3c   :  { %v56_v5 = vmul.f32 0.09090909, %v55_v4  ;;  %p174_p0 = pnand %p173_p13, %p167_p10 }
  0x3e   :  { %v57_v6 = vmax.f32 %v56_v5, 0.0 }
  0x40   :  { %94 = vrsqrt.f32 %v57_v6  ;;  %vm60_vm0 = vcmp.eq.f32.partialorder %v57_v6, inf  ;;  %v63_v8 = vand.u32 2147483648, %v57_v6  ;;  %vm62_vm1 = vcmp.eq.f32.partialorder %v57_v6, 0.0 }
  0x4a   :  { %v95_v7 = vpop.eup %94 }
  0x4b   :  { %v59_v9 = vmul.f32 %v95_v7, %v57_v6 }
  0x4d   :  { %v61_v10 = vsel %vm60_vm0, %v57_v6, %v59_v9 }
  0x4e   :  { %v64_v11 = vsel %vm62_vm1, %v63_v8, %v61_v10 }
  0x4f   :  { %v65_v12 = vadd.f32 1e-06, %v64_v11 }
  0x51   :  { %96 = vrcp.f32 %v65_v12 }
  0x5b   :  { %v97_v15 = vpop.eup %96 }
  0x5c   :  { %v68_v16 = vmul.f32 %v97_v15, %v66_v14 }
  0x5e   :  { %v69_v17 = vmul.f32 0.70710677, %v68_v16 }
  0x60   :  { %98 = verf.f32 %v69_v17 }
  0x6a   :  { %v99_v18 = vpop.eup %98 }
  0x6b   :  { %v71_v19 = vadd.f32 1.0, %v99_v18 }
  0x6d   :  { %v72_v20 = vmul.f32 0.5, %v71_v19 }
  0x6f   :  { %73 = vst [vmem:[#allocation8] sm:$0xff] %v72_v20 }
  0x70   :  { %177 = shalt.err (!%p174_p0)
}
  0x71   :  { %s178_s23 = scalar_lea.hbm %s269_s3, 128 }
  0x72   :  { %p179_p1 = scmp.ne.s32.totalorder %s269_s3, %s178_s23  ;;  %p182_p2 = scmp.lt.u32.totalorder %s178_s23, %s269_s3 }
  0x74   :  { %p184_p3 = pnand %p182_p2, %p179_p1 }
  0x76   :  { %187 = shalt.err (!%p184_p3)
}
  0x77   :  { %83 = dma.vmem_to_hbm [thread:$0]  %s81_s19, 128, %s269_s3, [#allocation4]  }
  0x78   :  { %192 = dma.done.wait [#allocation4], 128  }
  0x79   :  { %193 = vsyncadd [#allocation4], 4294967168 }
  0x7a   :  { %87 = vsyncpa [#allocation3], 1 }
  0x7b   :  { %88 = vsyncpa [#allocation6], 1 }
  0x7c   :  { %89 = vsyncpa [#allocation4], 1 }

</bundles_post_ra>
